<compile_context>
chip_gen: v7x
topology: tpu7x:2x2x1
jax: 0.10.0
libtpu: 0.0.40
codegen_flags: <defaults>
</compile_context>

<pallas_src>
import jax
import jax.numpy as jnp
from jax import lax
from jax.experimental import pallas as pl
from jax.experimental.pallas import tpu as pltpu

EPS = 1e-5
_LANES = 128


def _rowwise_kernel(x_ref, w_ref, b_ref, o_ref):
    """Fallback path: one normalized row per block row (C on lanes).

    Used when C does not divide 128 (or rows are not a multiple of G); it is
    already lane-dense whenever C is a multiple of 128.
    """
    x = x_ref[...].astype(jnp.float32)
    mu = jnp.mean(x, axis=-1, keepdims=True)
    xc = x - mu
    var = jnp.mean(xc * xc, axis=-1, keepdims=True)        # unbiased=False
    y = xc * lax.rsqrt(var + EPS)
    y = y * w_ref[...].astype(jnp.float32) + b_ref[...].astype(jnp.float32)
    o_ref[...] = y.astype(o_ref.dtype)


def _grouped_kernel(x_ref, w_ref, b_ref, mask_ref, o_ref):
    """Lane-dense path: G = 128 // C original rows packed per 128-lane row.

    Segment (per original row) means are computed as a block-diagonal masked
    matmul on the MXU:  mean[r, l] = sum_j x[r, j] * M[j, l],  with
    M[j, l] = 1/C iff j // C == l // C else 0 (precomputed, bf16-exact since
    C is a power of two).  Inputs are split hi/mid/lo into bf16 (bf16x3) so
    the result matches the f32 mean to ~1e-7 relative error regardless of
    the MXU's bf16 multiply path.  Everything stays 2-D and 128-lane dense.
    """
    x = x_ref[...].astype(jnp.float32)                      # (TR, 128), dense
    mask = mask_ref[...]                                    # (128, 128) bf16

    def group_mean(v):
        # bf16x3 split: v ~= h1 + h2 + h3.  Mask entries are exact in bf16,
        # so three bf16 MXU passes reproduce the f32 segmented mean.
        h1 = v.astype(jnp.bfloat16)
        r1 = v - h1.astype(jnp.float32)
        h2 = r1.astype(jnp.bfloat16)
        h3 = (r1 - h2.astype(jnp.float32)).astype(jnp.bfloat16)
        acc = jnp.dot(h1, mask, preferred_element_type=jnp.float32)
        acc = acc + jnp.dot(h2, mask, preferred_element_type=jnp.float32)
        acc = acc + jnp.dot(h3, mask, preferred_element_type=jnp.float32)
        return acc          # (TR, 128): each segment mean broadcast over its C lanes

    mu = group_mean(x)
    xc = x - mu
    var = group_mean(xc * xc)                               # centered two-pass, unbiased=False
    y = xc * lax.rsqrt(var + EPS)
    y = y * w_ref[...].astype(jnp.float32) + b_ref[...].astype(jnp.float32)
    o_ref[...] = y.astype(o_ref.dtype)


def _round_up(v, m):
    return (v + m - 1) // m * m


def _pick_row_tile(n_rows, row_bytes, block_bytes, min_grid_steps=8):
    """As many rows as fit `block_bytes` (multiple of 8), but capped so the
    grid keeps at least a few steps for megacore sharding / pipelining."""
    by_bytes = max(8, (block_bytes // row_bytes) // 8 * 8)
    by_steps = max(8, _round_up(pl.cdiv(n_rows, min_grid_steps), 8))
    return min(by_bytes, by_steps)


def withbias_layernorm(x, weight, bias, *, block_bytes=1 << 20):
    """LayerNorm over the last dim with affine weight/bias (WithBias_LayerNorm)."""
    orig_shape = x.shape
    C = orig_shape[-1]
    assert weight.shape == (C,) and bias.shape == (C,)

    x2 = x.reshape(-1, C)                                   # free: contiguous
    n_rows = x2.shape[0]

    G = _LANES // C if (C < _LANES and _LANES % C == 0) else 1
    use_grouped = G > 1 and n_rows % G == 0

    if use_grouped:
        L = G * C                                           # == 128 lanes, dense
        xv = x2.reshape(n_rows // G, L)                     # free: contiguous
        w2 = jnp.tile(weight, G).reshape(1, L)              # lane l -> channel l % C
        b2 = jnp.tile(bias, G).reshape(1, L)
        # Block-diagonal averaging mask, computed once on the host side of the
        # pallas_call and DMA'd into VMEM exactly once (its block index is
        # constant across the grid).  C divides 128 => C is a power of two
        # => 1/C is exact in bf16.
        rg = lax.broadcasted_iota(jnp.int32, (L, L), 0) // C
        cg = lax.broadcasted_iota(jnp.int32, (L, L), 1) // C
        mask = jnp.where(rg == cg, 1.0 / C, 0.0).astype(jnp.bfloat16)
        kernel = _grouped_kernel
        extra_inputs = (mask,)
        extra_specs = [pl.BlockSpec((L, L), lambda i: (0, 0))]
    else:
        L = C
        xv = x2
        w2 = weight.reshape(1, C)
        b2 = bias.reshape(1, C)
        kernel = _rowwise_kernel
        extra_inputs = ()
        extra_specs = []

    v_rows = xv.shape[0]
    tr = _pick_row_tile(v_rows, L * 4, block_bytes)
    grid = pl.cdiv(v_rows, tr)      # ragged last block: no pad, no output slice

    out = pl.pallas_call(
        kernel,
        out_shape=jax.ShapeDtypeStruct((v_rows, L), x.dtype),
        grid_spec=pltpu.PrefetchScalarGridSpec(
            num_scalar_prefetch=0,
            grid=(grid,),
            in_specs=[
                pl.BlockSpec((tr, L), lambda i: (i, 0)),
                pl.BlockSpec((1, L), lambda i: (0, 0)),
                pl.BlockSpec((1, L), lambda i: (0, 0)),
            ] + extra_specs,
            out_specs=pl.BlockSpec((tr, L), lambda i: (i, 0)),
        ),
        compiler_params=pltpu.CompilerParams(
            dimension_semantics=("parallel",),
            # ~4 MiB of double-buffered I/O + a few MiB of in-kernel temps:
            # well under this limit, which fits every generation's physical
            # VMEM (128/128/64 MiB) and stays below the v7x scoped ceiling.
            vmem_limit_bytes=32 * 1024 * 1024,
        ),
    )(xv, w2, b2, *extra_inputs)

    return out.reshape(orig_shape)


def _reference(x, weight, bias):
    mu = jnp.mean(x, axis=-1, keepdims=True)
    var = jnp.mean((x - mu) ** 2, axis=-1, keepdims=True)
    return (x - mu) / jnp.sqrt(var + EPS) * weight + bias


if __name__ == "__main__":
    key = jax.random.PRNGKey(0)
    kx, kw, kb = jax.random.split(key, 3)

    # Tokens of shape (B, H*W, C), normalized over C (how the module is used).
    cases = [
        (2, 16 * 16, 32),   # grouped lane-dense path (G=4), grid divides evenly
        (1, 360, 32),       # grouped path with a ragged last block
        (3, 63, 48),        # row-wise fallback (48 does not divide 128), ragged
    ]

    for (B, N, C) in cases:
        x = jax.random.normal(kx, (B, N, C), dtype=jnp.float32)
        # Module __init__ is weight=ones, bias=zeros; perturb them
        # (deterministically) so the affine part of the forward is exercised.
        weight = 1.0 + 0.1 * jax.random.normal(kw, (C,), dtype=jnp.float32)
        bias = 0.1 * jax.random.normal(kb, (C,), dtype=jnp.float32)

        out = jax.block_until_ready(withbias_layernorm(x, weight, bias))
        ref = _reference(x, weight, bias)

        assert out.shape == x.shape and out.dtype == x.dtype
        if not jnp.allclose(out, ref, atol=1e-5, rtol=1e-5):
            err = float(jnp.max(jnp.abs(out - ref)))
            raise AssertionError(f"mismatch vs reference for {(B, N, C)}: max abs err {err}")

    print("KERNEL_OK")
</pallas_src>

<mosaic_0001>
module attributes {stable_mosaic.version = 11 : i64} {
  func.func @_grouped_kernel(%arg0: i32, %arg1: memref<16x128xf32, #tpu.memory_space<vmem>>, %arg2: memref<1x128xf32, #tpu.memory_space<vmem>>, %arg3: memref<1x128xf32, #tpu.memory_space<vmem>>, %arg4: memref<128x128xbf16, #tpu.memory_space<vmem>>, %arg5: memref<16x128xf32, #tpu.memory_space<vmem>>) attributes {dimension_semantics = [#tpu.dimension_semantics<parallel>], iteration_bounds = array<i64: 8>, scalar_prefetch = 0 : i64, scratch_operands = 0 : i64, tpu.core_type = #tpu.core_type<tc>, window_params = [{transform_indices = @transform_0, window_bounds = array<i64: 16, 128>}, {pipeline_mode = #tpu.pipeline_mode<synchronous>, transform_indices = @transform_1, window_bounds = array<i64: 1, 128>}, {pipeline_mode = #tpu.pipeline_mode<synchronous>, transform_indices = @transform_2, window_bounds = array<i64: 1, 128>}, {pipeline_mode = #tpu.pipeline_mode<synchronous>, transform_indices = @transform_3, window_bounds = array<i64: 128, 128>}, {transform_indices = @transform_4, window_bounds = array<i64: 16, 128>}]} {
    %c0 = arith.constant 0 : index
    %c0_0 = arith.constant 0 : index
    %0 = vector.load %arg1[%c0, %c0_0] : memref<16x128xf32, #tpu.memory_space<vmem>>, vector<16x128xf32>
    %c0_1 = arith.constant 0 : index
    %c0_2 = arith.constant 0 : index
    %1 = vector.load %arg4[%c0_1, %c0_2] : memref<128x128xbf16, #tpu.memory_space<vmem>>, vector<128x128xbf16>
    %2 = arith.truncf %0 : vector<16x128xf32> to vector<16x128xbf16>
    %3 = arith.extf %2 : vector<16x128xbf16> to vector<16x128xf32>
    %4 = arith.subf %0, %3 : vector<16x128xf32>
    %5 = arith.truncf %4 : vector<16x128xf32> to vector<16x128xbf16>
    %6 = arith.extf %5 : vector<16x128xbf16> to vector<16x128xf32>
    %7 = arith.subf %4, %6 : vector<16x128xf32>
    %8 = arith.truncf %7 : vector<16x128xf32> to vector<16x128xbf16>
    %cst = arith.constant dense<0.000000e+00> : vector<16x128xf32>
    %9 = tpu.matmul %2, %1, %cst {dimension_numbers = #tpu.dot_dimension_numbers<[1], [0], [0], [1], [0, 0, 1, 1], [], []>} : vector<16x128xbf16>, vector<128x128xbf16>, vector<16x128xf32> -> vector<16x128xf32>
    %cst_3 = arith.constant dense<0.000000e+00> : vector<16x128xf32>
    %10 = tpu.matmul %5, %1, %cst_3 {dimension_numbers = #tpu.dot_dimension_numbers<[1], [0], [0], [1], [0, 0, 1, 1], [], []>} : vector<16x128xbf16>, vector<128x128xbf16>, vector<16x128xf32> -> vector<16x128xf32>
    %11 = arith.addf %9, %10 : vector<16x128xf32>
    %cst_4 = arith.constant dense<0.000000e+00> : vector<16x128xf32>
    %12 = tpu.matmul %8, %1, %cst_4 {dimension_numbers = #tpu.dot_dimension_numbers<[1], [0], [0], [1], [0, 0, 1, 1], [], []>} : vector<16x128xbf16>, vector<128x128xbf16>, vector<16x128xf32> -> vector<16x128xf32>
    %13 = arith.addf %11, %12 : vector<16x128xf32>
    %14 = arith.subf %0, %13 : vector<16x128xf32>
    %15 = arith.mulf %14, %14 : vector<16x128xf32>
    %16 = arith.truncf %15 : vector<16x128xf32> to vector<16x128xbf16>
    %17 = arith.extf %16 : vector<16x128xbf16> to vector<16x128xf32>
    %18 = arith.subf %15, %17 : vector<16x128xf32>
    %19 = arith.truncf %18 : vector<16x128xf32> to vector<16x128xbf16>
    %20 = arith.extf %19 : vector<16x128xbf16> to vector<16x128xf32>
    %21 = arith.subf %18, %20 : vector<16x128xf32>
    %22 = arith.truncf %21 : vector<16x128xf32> to vector<16x128xbf16>
    %cst_5 = arith.constant dense<0.000000e+00> : vector<16x128xf32>
    %23 = tpu.matmul %16, %1, %cst_5 {dimension_numbers = #tpu.dot_dimension_numbers<[1], [0], [0], [1], [0, 0, 1, 1], [], []>} : vector<16x128xbf16>, vector<128x128xbf16>, vector<16x128xf32> -> vector<16x128xf32>
    %cst_6 = arith.constant dense<0.000000e+00> : vector<16x128xf32>
    %24 = tpu.matmul %19, %1, %cst_6 {dimension_numbers = #tpu.dot_dimension_numbers<[1], [0], [0], [1], [0, 0, 1, 1], [], []>} : vector<16x128xbf16>, vector<128x128xbf16>, vector<16x128xf32> -> vector<16x128xf32>
    %25 = arith.addf %23, %24 : vector<16x128xf32>
    %cst_7 = arith.constant dense<0.000000e+00> : vector<16x128xf32>
    %26 = tpu.matmul %22, %1, %cst_7 {dimension_numbers = #tpu.dot_dimension_numbers<[1], [0], [0], [1], [0, 0, 1, 1], [], []>} : vector<16x128xbf16>, vector<128x128xbf16>, vector<16x128xf32> -> vector<16x128xf32>
    %27 = arith.addf %25, %26 : vector<16x128xf32>
    %cst_8 = arith.constant 9.99999974E-6 : f32
    %28 = vector.broadcast %cst_8 : f32 to vector<16x128xf32>
    %29 = arith.addf %27, %28 : vector<16x128xf32>
    %30 = math.rsqrt %29 : vector<16x128xf32>
    %31 = arith.mulf %14, %30 : vector<16x128xf32>
    %c0_9 = arith.constant 0 : index
    %c0_10 = arith.constant 0 : index
    %32 = vector.load %arg2[%c0_9, %c0_10] : memref<1x128xf32, #tpu.memory_space<vmem>>, vector<1x128xf32>
    %33 = vector.broadcast %32 : vector<1x128xf32> to vector<16x128xf32>
    %34 = arith.mulf %31, %33 : vector<16x128xf32>
    %c0_11 = arith.constant 0 : index
    %c0_12 = arith.constant 0 : index
    %35 = vector.load %arg3[%c0_11, %c0_12] : memref<1x128xf32, #tpu.memory_space<vmem>>, vector<1x128xf32>
    %36 = vector.broadcast %35 : vector<1x128xf32> to vector<16x128xf32>
    %37 = arith.addf %34, %36 : vector<16x128xf32>
    %c0_13 = arith.constant 0 : index
    %c0_14 = arith.constant 0 : index
    %38 = vector.load %arg5[%c0_13, %c0_14] : memref<16x128xf32, #tpu.memory_space<vmem>>, vector<16x128xf32>
    tpu.vector_store %arg5[%c0_13, %c0_14], %37 {strides = array<i32>} : memref<16x128xf32, #tpu.memory_space<vmem>>, vector<16x128xf32>,
    return
  }
  func.func @transform_0(%arg0: i32) -> (i32, i32) {
    %c0_i32 = arith.constant 0 : i32
    %c0_i32_0 = arith.constant 0 : i32
    return %arg0, %c0_i32 : i32, i32
  }
  func.func @transform_1(%arg0: i32) -> (i32, i32) {
    %c0_i32 = arith.constant 0 : i32
    %c0_i32_0 = arith.constant 0 : i32
    %c0_i32_1 = arith.constant 0 : i32
    return %c0_i32, %c0_i32_0 : i32, i32
  }
  func.func @transform_2(%arg0: i32) -> (i32, i32) {
    %c0_i32 = arith.constant 0 : i32
    %c0_i32_0 = arith.constant 0 : i32
    %c0_i32_1 = arith.constant 0 : i32
    return %c0_i32, %c0_i32_0 : i32, i32
  }
  func.func @transform_3(%arg0: i32) -> (i32, i32) {
    %c0_i32 = arith.constant 0 : i32
    %c0_i32_0 = arith.constant 0 : i32
    %c0_i32_1 = arith.constant 0 : i32
    return %c0_i32, %c0_i32_0 : i32, i32
  }
  func.func @transform_4(%arg0: i32) -> (i32, i32) {
    %c0_i32 = arith.constant 0 : i32
    %c0_i32_0 = arith.constant 0 : i32
    return %arg0, %c0_i32 : i32, i32
  }
}

</mosaic_0001>

<bundles_post_ra>
// kernel: tpu_custom_call.1
= control target key start
LH: loop header
LB: loop body
LE: loop exit
PB: predicated region body
PF: predicated region fallthrough
CT: control target
= control target key end

     0   :  { %9 = vsyncpa [#allocation3], 0  ;;  %s1498_s0 = inlined_call_operand.hbm [shape: f32[128,128], index: 0, kind: input, shape index: {}]   ;;  %s1499_s1 = inlined_call_operand.vmem [shape: f32[1,128], index: 1, kind: input, shape index: {}]   ;;  %s1500_s2 = inlined_call_operand.vmem [shape: f32[1,128], index: 2, kind: input, shape index: {}]   ;;  %s1501_s3 = inlined_call_operand.hbm [shape: bf16[128,128], index: 3, kind: input, shape index: {}]   ;;  %s1502_s4 = inlined_call_operand.hbm [shape: f32[128,128], index: 4, kind: output, shape index: {}]  }
   0x1   :  { %11 = vsyncpa [#allocation3 + $0x1], 0 }
   0x2   :  { %12 = vsyncpa [#allocation6], 0 }
   0x3   :  { %13 = vsyncpa [#allocation4], 0 }
   0x4   :  { %15 = vsyncpa [#allocation4 + $0x1], 0  ;;  %s1152_s15 = smov 0   ;;  %s1154_s16 = smov 0  }
   0x5   :  { %s1156_s17 = smov 0   ;;  %s1158_s18 = smov 0  }
   0x6 LB: > { %s1173_s19 = sadd.s32 4294967295, %s1114_s18   ;;  %s699_s20 = sadd.s32 4294967294, %s1114_s18   ;;  %s1114_s18 = sphi %s1158_s18, %s1521_s18   ;;  %s1110_s17 = sphi %s1156_s17, %s1520_s17   ;;  %s1106_s16 = sphi %s1154_s16, %s1519_s16   ;;  %s1102_s15 = sphi %s1152_s15, %s1518_s15  }
   0x7   : > { %p41_p0 = scmp.ne.s32.totalorder %s1106_s16, %s1102_s15  ;;  %p1503_p1 = scmp.eq.s32.totalorder %s1173_s19, 0 }
   0x8   : > { %p134_p3 = scmp.eq.s32.totalorder %s699_s20, 7  ;;  %p700_p5 = scmp.ge.s32.totalorder %s1114_s18, 1 }
   0x9   : > { %p1182_p4 = por %p1503_p1, %p41_p0  ;;  %p141_p7 = scmp.lt.s32.totalorder %s1114_s18, 9 }
   0xa   : > { %p1187_p6 = por %p134_p3, %p41_p0  ;;  %s1116_s24 = smov [#allocation5]  }
   0xb   : > { %s1506_s21 = scalar_select %p1182_p4, 1, 0 }
   0xc   : > { %s1507_s22 = scalar_select %p1187_p6, 1, 0 }
   0xd   : > { %p1192_p8 = pnand %p700_p5, %p141_p7  ;;  %s159_s25 = sshll.u32 %s1116_s24, 4  ;;  %s160_s25 = int_to_ptr.vmem [resolvable:$true] %s159_s25 }
   0xe   : > { %s1205_s27 = sadd.s32 1, %s1114_s18   ;;  %s28_s28 = sadd.s32 1, %s1110_s17 }
   0xf   : > { %s1508_s23 = scalar_select %p1192_p8, 1, 0 }
  0x10   : > { %p917_p9 = pneg %p1192_p8  ;;  %s25_s29 = ssub.s32 %s1114_s18, %s1205_s27 }
  0x11   : > { %s986_s6 = scalar_lea.hbm %s1501_s3, 1024 }
  0x12   : > { %p1200_p10 = pnand %p917_p9, %p1503_p1  ;;  %p987_p11 = scmp.ne.s32.totalorder %s1501_s3, %s986_s6 }
  0x13   : > { %p993_p3 = scmp.lt.u32.totalorder %s986_s6, %s1501_s3 }
  0x14   : > { %p988_p12 = pneg %p1200_p10 }
  0x16   : > { %p989_p13 = pnand %p988_p12, %p987_p11 }
  0x18   : > { %p990_p0 = pneg %p989_p13 }
  0x1a   : > { %p995_p5 = pnand %p993_p3, %p990_p0 }
  0x1c   : > { %998 = shalt.err (!%p995_p5)
}
  0x1d   : > { %s999_s11 = scalar_lea.vmem %s160_s25, 1024  ;;  %p1007_p2 = scmp.lt.s32.totalorder %s160_s25, %s160_s25 }
  0x1e   : > { %p1000_p7 = scmp.ne.s32.totalorder %s160_s25, %s999_s11  ;;  %p1008_p6 = scmp.lt.s32.totalorder %s999_s11, %s999_s11 }
  0x20   : > { %p1002_p9 = pnand %p1000_p7, %p988_p12  ;;  %p1009_p4 = por %p1008_p6, %p1007_p2 }
  0x22   : > { %p1003_p1 = pneg %p1002_p9 }
  0x24   : > { %p1010_p8 = pnand %p1009_p4, %p1003_p1 }
  0x26   : > { %1013 = shalt.err (!%p1010_p8)
}
  0x27   : > { %s1117_s12 = smov 64   ;;  %s1118_s13 = smov 4  }
  0x28   : > { %920 = dma.hbm_to_vmem [thread:$0]  (!%p1200_p10), %s1501_s3, 1024, %s160_s25, [#allocation6], %s1117_s12, %s1117_s12, %s1118_s13  }
  0x29   : > { %p26_p11 = scmp.eq.s32.totalorder %s25_s29, 0  ;;  %p35_p2 = scmp.ne.s32.totalorder %s1110_s17, %s1106_s16 }
  0x2a   : > { %p36_p1 = scmp.eq.s32.totalorder %s1114_s18, 0  ;;  %p930_p4 = scmp.lt.s32.totalorder %s1114_s18, 8 }
  0x2b   : > { %s1231_s24 = scalar_select %p26_p11, %s1110_s17, %s28_s28  }
  0x2c   : > { %p37_p6 = por %p36_p1, %p35_p2  ;;  %p1510_p8 = scmp.eq.s32.totalorder %s1173_s19, 7 }
  0x2d   : > { %s173_s5 = sand.u32 1, %s1110_s17   ;;  %s725_s6 = sshll.u32 %s1114_s18, 8 }
  0x2e   : > { %p1235_p12 = por %p1510_p8, %p35_p2  ;;  %s703_s7 = sshll.u32 %s173_s5, 4 }
  0x2f   : > { %s1244_s9 = scalar_lea.hbm %s1498_s0, %s725_s6  ;;  %s177_s25 = scalar_lea.vmem [#allocation2], %s703_s7 }
  0x30   : > { %s184_s28 = sshll.u32 %s177_s25, 4  ;;  %p1246_p10 = pnand %p930_p4, %p37_p6  ;;  %s1250_s28 = int_to_ptr.vmem [resolvable:$true] %s184_s28 }
  0x31   : > { %s1252_s10 = scalar_lea.sflag [#allocation3], %s173_s5  ;;  %s1014_s11 = scalar_lea.hbm %s1244_s9, 256 }
  0x32   : > { %p1015_p13 = scmp.ne.s32.totalorder %s1244_s9, %s1014_s11  ;;  %p1016_p0 = pneg %p1246_p10 }
  0x33   : > { %s1019_s14 = scalar_lea.hbm %s1498_s0, 2048  ;;  %p1020_p7 = scmp.lt.u32.totalorder %s1244_s9, %s1498_s0 }
  0x34   : > { %p1017_p3 = pnand %p1016_p0, %p1015_p13  ;;  %p1021_p9 = scmp.lt.u32.totalorder %s1019_s14, %s1014_s11 }
  0x35   : > { %p1023_p2 = scmp.lt.u32.totalorder %s1014_s11, %s1244_s9 }
  0x36   : > { %p1018_p5 = pneg %p1017_p3  ;;  %p1022_p11 = por %p1021_p9, %p1020_p7 }
  0x38   : > { %p1024_p1 = por %p1023_p2, %p1022_p11 }
  0x3a   : > { %p1025_p4 = pnand %p1024_p1, %p1018_p5 }
  0x3c   : > { %1028 = shalt.err (!%p1025_p4)
}
  0x3d   : > { %s1029_s5 = scalar_lea.vmem %s1250_s28, 256  ;;  %s1119_s7 = smov [#allocation2]  }
  0x3e   : > { %p1030_p6 = scmp.ne.s32.totalorder %s1250_s28, %s1029_s5  ;;  %s1034_s26 = sshll.u32 %s1119_s7, 4  ;;  %s1035_s26 = int_to_ptr.vmem [resolvable:$false] %s1034_s26 }
  0x3f   : > { %s1036_s8 = scalar_lea.vmem %s1035_s26, 512  ;;  %p1037_p3 = scmp.lt.s32.totalorder %s1250_s28, %s1035_s26 }
  0x40   : > { %p1032_p8 = pnand %p1030_p6, %p1016_p0  ;;  %p1038_p7 = scmp.lt.s32.totalorder %s1036_s8, %s1029_s5 }
  0x42   : > { %p1033_p13 = pneg %p1032_p8  ;;  %p1039_p9 = por %p1038_p7, %p1037_p3 }
  0x44   : > { %p1040_p11 = pnand %p1039_p9, %p1033_p13 }
  0x46   : > { %1043 = shalt.err (!%p1040_p11)
}
  0x47   : > { %s1120_s25 = smov 128   ;;  %s1121_s11 = smov 8  }
  0x48   : > { %924 = dma.hbm_to_vmem [thread:$0]  (!%p1246_p10), %s1244_s9, 256, %s1250_s28, %s1252_s10, %s1120_s25, %s1120_s25, %s1121_s11  }
  0x49   : > { %p1513_p0 = scmp.ne.s32.totalorder %s1508_s23, 0 }
  0x4a   : > { %s1283_s12 = sand.u32 (!%p1513_p0), 1, %s1106_s16   ;;  %p1514_p5 = scmp.ne.s32.totalorder (!%p1513_p0), %s1506_s21, 0 }
  0x4b   : > { %196 = sbr.rel (%p1513_p0) target bundleno = 724 (0x2d4), region = 36  ;;  %s707_s13 = sshll.u32 (!%p1513_p0), %s1283_s12, 4 }
  0x4c   : > { %s199_s14 = scalar_lea.sflag (!%p1513_p0), [#allocation3], %s1283_s12  ;;  %s202_s20 = scalar_lea.vmem (!%p1513_p0), [#allocation2], %s707_s13 }
  0x52   : > { %1089 = dma.done.wait (%p1514_p5), %s199_s14, 256  }
  0x53   : > { %1091 = vsyncadd (%p1514_p5), %s199_s14, 4294967040  ;;  %p1515_p10 = scmp.eq.s32.totalorder %s1173_s19, 0 }
  0x55   : > { %1093 = dma.done.wait (%p1515_p10), [#allocation6], 1024   ;;  %p1516_p2 = pmov %p1515_p10 }
  0x56   : > { %v1122_v0 = vmov 0.0   ;;  %vm1123_vm0 = vmmov 0   ;;  %v1303_v1 = vld [vmem:[#allocation5] sm:$0xff]   ;;  %v1306_v2 = vld [vmem:[#allocation5 + $0x8] sm:$0xff]   ;;  %v1312_v3 = vld [vmem:[#allocation5 + $0x10] sm:$0xff]   ;;  %s726_s29 = sshll.u32 %s1173_s19, 8 }
  0x57   : > { %1095 = vsyncadd (%p1516_p2), [#allocation6], 4294966272  ;;  %781 = vmatprep.subr.bf16.mxu0 %v1122_v0  ;;  %797 = vmatprep.mubr.msk.bf16.mxu0 %vm1123_vm0, %v1122_v0  ;;  %v1318_v4 = vld [vmem:[#allocation5 + $0x18] sm:$0xff]   ;;  %v1324_v5 = vld [vmem:[#allocation5 + $0x20] sm:$0xff]   ;;  %s230_s10 = scalar_lea.vmem [#allocation7], %s707_s13  ;;  %s1453_s26 = scalar_lea.hbm %s1502_s4, %s726_s29 }
  0x58   : > { %841 = vmatprep.subr.bf16.mxu1 %v1122_v0  ;;  %857 = vmatprep.mubr.msk.bf16.mxu1 %vm1123_vm0, %v1122_v0  ;;  %v1326_v6 = vld [vmem:[%s202_s20] sm:$0xff]  ;;  %v1328_v7 = vld [vmem:[%s202_s20 + $0x8] sm:$0xff]  ;;  %s616_s6 = sshll.u32 %s230_s10, 4  ;;  %s603_s8 = scalar_lea.sflag [#allocation4], %s1283_s12  ;;  %s1455_s6 = int_to_ptr.vmem [resolvable:$true] %s616_s6 }
  0x59   : > { %782 = vmatpush3.bf16.msra.mxu0 %v1303_v1  ;;  %842 = vmatpush3.bf16.msra.mxu1 %v1303_v1  ;;  %v252_v8 = vpack.c.bf16 %v1328_v7, %v1326_v6  ;;  %v1336_v9 = vld [vmem:[#allocation5 + $0x28] sm:$0xff]   ;;  %v1342_v12 = vld [vmem:[#allocation5 + $0x30] sm:$0xff]   ;;  %v1350_v15 = vld [vmem:[#allocation5 + $0x38] sm:$0xff]   ;;  %s1044_s19 = scalar_lea.vmem %s1455_s6, 256  ;;  %s1124_s25 = smov [#allocation7]  }
  0x5a   : > { %783 = vmatprep.subr.bf16.mxu0 %v1122_v0  ;;  %843 = vmatprep.subr.bf16.mxu1 %v1122_v0  ;;  %v718_v60 = vld [vmem:[%s1499_s1] ss:$0 sm:$0xff]  ;;  %p1045_p1 = scmp.ne.s32.totalorder %s1455_s6, %s1044_s19  ;;  %s1048_s11 = sshll.u32 %s1124_s25, 4  ;;  %s1049_s11 = int_to_ptr.vmem [resolvable:$false] %s1048_s11 }
  0x5b   : > { %v253_v10 = vunpack.c.l.bf16 %v252_v8  ;;  %v254_v11 = vunpack.c.h.bf16 %v252_v8  ;;  %v719_v63 = vld [vmem:[%s1500_s2] ss:$0 sm:$0xff]  ;;  %s1050_s13 = scalar_lea.vmem %s1049_s11, 512  ;;  %p1051_p8 = scmp.lt.s32.totalorder %s1455_s6, %s1049_s11 }
  0x5c   : > { %p1046_p4 = pnand %p1045_p1, %p1235_p12  ;;  %p1052_p13 = scmp.lt.s32.totalorder %s1050_s13, %s1044_s19 }
  0x5d   : > { %784 = vmatpush3.bf16.msra.mxu0 %v1306_v2  ;;  %844 = vmatpush3.bf16.msra.mxu1 %v1306_v2  ;;  %v255_v13 = vsub.f32 %v1326_v6, %v253_v10  ;;  %v256_v14 = vsub.f32 %v1328_v7, %v254_v11 }
  0x5e   : > { %785 = vmatprep.subr.bf16.mxu0 %v1122_v0  ;;  %845 = vmatprep.subr.bf16.mxu1 %v1122_v0  ;;  %p1047_p6 = pneg %p1046_p4  ;;  %p1053_p3 = por %p1052_p13, %p1051_p8 }
  0x5f   : > { %v257_v16 = vpack.c.bf16 %v256_v14, %v255_v13 }
  0x60   : > { %p1054_p7 = pnand %p1053_p3, %p1047_p6 }
  0x61   : > { %786 = vmatpush3.bf16.msra.mxu0 %v1312_v3  ;;  %846 = vmatpush3.bf16.msra.mxu1 %v1312_v3  ;;  %v258_v17 = vunpack.c.l.bf16 %v257_v16  ;;  %v259_v18 = vunpack.c.h.bf16 %v257_v16 }
  0x62   : > { %787 = vmatprep.subr.bf16.mxu0 %v1122_v0  ;;  %847 = vmatprep.subr.bf16.mxu1 %v1122_v0 }
  0x63   : > { %v260_v19 = vsub.f32 %v255_v13, %v258_v17  ;;  %v261_v20 = vsub.f32 %v256_v14, %v259_v18 }
  0x65   : > { %788 = vmatpush3.bf16.msra.mxu0 %v1318_v4  ;;  %848 = vmatpush3.bf16.msra.mxu1 %v1318_v4  ;;  %v262_v21 = vpack.c.bf16 %v261_v20, %v260_v19 }
  0x66   : > { %789 = vmatprep.subr.bf16.mxu0 %v1122_v0  ;;  %849 = vmatprep.subr.bf16.mxu1 %v1122_v0 }
  0x69   : > { %790 = vmatpush3.bf16.msra.mxu0 %v1324_v5  ;;  %850 = vmatpush3.bf16.msra.mxu1 %v1324_v5 }
  0x6a   : > { %791 = vmatprep.subr.bf16.mxu0 %v1122_v0  ;;  %851 = vmatprep.subr.bf16.mxu1 %v1122_v0 }
  0x6d   : > { %792 = vmatpush3.bf16.msra.mxu0 %v1336_v9  ;;  %852 = vmatpush3.bf16.msra.mxu1 %v1336_v9 }
  0x6e   : > { %793 = vmatprep.subr.bf16.mxu0 %v1122_v0  ;;  %853 = vmatprep.subr.bf16.mxu1 %v1122_v0 }
  0x71   : > { %794 = vmatpush3.bf16.msra.mxu0 %v1342_v12  ;;  %854 = vmatpush3.bf16.msra.mxu1 %v1342_v12 }
  0x72   : > { %795 = vmatprep.subr.bf16.mxu0 %v1122_v0  ;;  %855 = vmatprep.subr.bf16.mxu1 %v1122_v0 }
  0x75   : > { %796 = vmatpush3.bf16.msra.mxu0 %v1350_v15  ;;  %856 = vmatpush3.bf16.msra.mxu1 %v1350_v15 }
  0x76   : > { %801 = vmatprep.subr.bf16.mxu0 %v1122_v0  ;;  %861 = vmatprep.subr.bf16.mxu1 %v1122_v0 }
  0x78   : > { %798 = vmatmul.mubr.bf16.vlgmr.msra.gmra.mrb[0].mxu0 %v257_v16 }
  0x79   : > { %802 = vmatpush3.bf16.msra.mxu0 %v1303_v1  ;;  %817 = vmatprep.mubr.msk.bf16.mxu0 %vm1123_vm0, %v1122_v0 }
  0x7a   : > { %803 = vmatprep.subr.bf16.mxu0 %v1122_v0 }
  0x7d   : > { %804 = vmatpush3.bf16.msra.mxu0 %v1306_v2 }
  0x7e   : > { %805 = vmatprep.subr.bf16.mxu0 %v1122_v0 }
  0x81   : > { %806 = vmatpush3.bf16.msra.mxu0 %v1312_v3 }
  0x82   : > { %807 = vmatprep.subr.bf16.mxu0 %v1122_v0 }
  0x85   : > { %808 = vmatpush3.bf16.msra.mxu0 %v1318_v4 }
  0x86   : > { %809 = vmatprep.subr.bf16.mxu0 %v1122_v0 }
  0x89   : > { %810 = vmatpush3.bf16.msra.mxu0 %v1324_v5 }
  0x8a   : > { %811 = vmatprep.subr.bf16.mxu0 %v1122_v0 }
  0x8d   : > { %812 = vmatpush3.bf16.msra.mxu0 %v1336_v9 }
  0x8e   : > { %813 = vmatprep.subr.bf16.mxu0 %v1122_v0 }
  0x91   : > { %814 = vmatpush3.bf16.msra.mxu0 %v1342_v12 }
  0x92   : > { %815 = vmatprep.subr.bf16.mxu0 %v1122_v0 }
  0x95   : > { %816 = vmatpush3.bf16.msra.mxu0 %v1350_v15 }
  0x96   : > { %821 = vmatprep.subr.bf16.mxu0 %v1122_v0 }
  0x98   : > { %818 = vmatmul.mubr.bf16.vlgmr.msra.gmra.mrb[0].mxu0 %v252_v8 }
  0x99   : > { %822 = vmatpush3.bf16.msra.mxu0 %v1303_v1  ;;  %837 = vmatprep.mubr.msk.bf16.mxu0 %vm1123_vm0, %v1122_v0 }
  0x9a   : > { %823 = vmatprep.subr.bf16.mxu0 %v1122_v0 }
  0x9d   : > { %824 = vmatpush3.bf16.msra.mxu0 %v1306_v2 }
  0x9e   : > { %825 = vmatprep.subr.bf16.mxu0 %v1122_v0 }
  0xa1   : > { %826 = vmatpush3.bf16.msra.mxu0 %v1312_v3 }
  0xa2   : > { %827 = vmatprep.subr.bf16.mxu0 %v1122_v0 }
  0xa5   : > { %828 = vmatpush3.bf16.msra.mxu0 %v1318_v4 }
  0xa6   : > { %829 = vmatprep.subr.bf16.mxu0 %v1122_v0 }
  0xa9   : > { %830 = vmatpush3.bf16.msra.mxu0 %v1324_v5 }
  0xaa   : > { %831 = vmatprep.subr.bf16.mxu0 %v1122_v0 }
  0xad   : > { %832 = vmatpush3.bf16.msra.mxu0 %v1336_v9 }
  0xae   : > { %833 = vmatprep.subr.bf16.mxu0 %v1122_v0 }
  0xb1   : > { %834 = vmatpush3.bf16.msra.mxu0 %v1342_v12 }
  0xb2   : > { %835 = vmatprep.subr.bf16.mxu0 %v1122_v0 }
  0xb5   : > { %836 = vmatpush3.bf16.msra.mxu0 %v1350_v15 }
  0xb8   : > { %838 = vmatmul.mubr.bf16.vlgmr.msra.gmra.mrb[0].mxu0 %v262_v21 }
 0x18b   : > { %v427_v22 = vpop.f32.mrb[0].mxu0 }
 0x18c   : > { %v1395_v23 = vsub.f32 %v1326_v6, %v427_v22  ;;  %v839_v24 = vpop.f32.mrb[1].mxu0 }
 0x18d   : > { %v430_v25 = vpop.f32.mrb[2].mxu0 }
 0x18e   : > { %v1398_v26 = vsub.f32 %v1328_v7, %v430_v25  ;;  %v840_v27 = vpop.f32.mrb[3].mxu0  ;;  %v438_v28 = vmul.f32 %v1395_v23, %v1395_v23 }
 0x190   : > { %v439_v29 = vmul.f32 %v1398_v26, %v1398_v26 }
 0x192   : > { %v440_v30 = vpack.c.bf16 %v439_v29, %v438_v28 }
 0x194   : > { %v442_v31 = vunpack.c.h.bf16 %v440_v30  ;;  %v441_v32 = vunpack.c.l.bf16 %v440_v30 }
 0x196   : > { %v444_v33 = vsub.f32 %v439_v29, %v442_v31  ;;  %v443_v34 = vsub.f32 %v438_v28, %v441_v32 }
 0x198   : > { %v445_v35 = vpack.c.bf16 %v444_v33, %v443_v34 }
 0x19a   : > { %858 = vmatmul.mubr.bf16.vlgmr.msra.gmra.mrb[0].mxu1 %v445_v35  ;;  %v446_v36 = vunpack.c.l.bf16 %v445_v35  ;;  %v447_v37 = vunpack.c.h.bf16 %v445_v35 }
 0x19b   : > { %862 = vmatpush3.bf16.msra.mxu1 %v1303_v1  ;;  %877 = vmatprep.mubr.msk.bf16.mxu1 %vm1123_vm0, %v1122_v0 }
 0x19c   : > { %863 = vmatprep.subr.bf16.mxu1 %v1122_v0  ;;  %v448_v38 = vsub.f32 %v443_v34, %v446_v36  ;;  %v449_v39 = vsub.f32 %v444_v33, %v447_v37 }
 0x19e   : > { %v450_v40 = vpack.c.bf16 %v449_v39, %v448_v38 }
 0x19f   : > { %864 = vmatpush3.bf16.msra.mxu1 %v1306_v2 }
 0x1a0   : > { %865 = vmatprep.subr.bf16.mxu1 %v1122_v0 }
 0x1a3   : > { %866 = vmatpush3.bf16.msra.mxu1 %v1312_v3 }
 0x1a4   : > { %867 = vmatprep.subr.bf16.mxu1 %v1122_v0 }
 0x1a7   : > { %868 = vmatpush3.bf16.msra.mxu1 %v1318_v4 }
 0x1a8   : > { %869 = vmatprep.subr.bf16.mxu1 %v1122_v0 }
 0x1ab   : > { %870 = vmatpush3.bf16.msra.mxu1 %v1324_v5 }
 0x1ac   : > { %871 = vmatprep.subr.bf16.mxu1 %v1122_v0 }
 0x1af   : > { %872 = vmatpush3.bf16.msra.mxu1 %v1336_v9 }
 0x1b0   : > { %873 = vmatprep.subr.bf16.mxu1 %v1122_v0 }
 0x1b3   : > { %874 = vmatpush3.bf16.msra.mxu1 %v1342_v12 }
 0x1b4   : > { %875 = vmatprep.subr.bf16.mxu1 %v1122_v0 }
 0x1b7   : > { %876 = vmatpush3.bf16.msra.mxu1 %v1350_v15 }
 0x1b8   : > { %881 = vmatprep.subr.bf16.mxu1 %v1122_v0 }
 0x1ba   : > { %878 = vmatmul.mubr.bf16.vlgmr.msra.gmra.mrb[4].mxu1 %v440_v30 }
 0x1bb   : > { %882 = vmatpush3.bf16.msra.mxu1 %v1303_v1  ;;  %897 = vmatprep.mubr.msk.bf16.mxu1 %vm1123_vm0, %v1122_v0 }
 0x1bc   : > { %883 = vmatprep.subr.bf16.mxu1 %v1122_v0 }
 0x1bf   : > { %884 = vmatpush3.bf16.msra.mxu1 %v1306_v2 }
 0x1c0   : > { %885 = vmatprep.subr.bf16.mxu1 %v1122_v0 }
 0x1c3   : > { %886 = vmatpush3.bf16.msra.mxu1 %v1312_v3 }
 0x1c4   : > { %887 = vmatprep.subr.bf16.mxu1 %v1122_v0 }
 0x1c7   : > { %888 = vmatpush3.bf16.msra.mxu1 %v1318_v4 }
 0x1c8   : > { %889 = vmatprep.subr.bf16.mxu1 %v1122_v0 }
 0x1cb   : > { %890 = vmatpush3.bf16.msra.mxu1 %v1324_v5 }
 0x1cc   : > { %891 = vmatprep.subr.bf16.mxu1 %v1122_v0 }
 0x1cf   : > { %892 = vmatpush3.bf16.msra.mxu1 %v1336_v9 }
 0x1d0   : > { %893 = vmatprep.subr.bf16.mxu1 %v1122_v0 }
 0x1d3   : > { %894 = vmatpush3.bf16.msra.mxu1 %v1342_v12 }
 0x1d4   : > { %895 = vmatprep.subr.bf16.mxu1 %v1122_v0 }
 0x1d7   : > { %896 = vmatpush3.bf16.msra.mxu1 %v1350_v15 }
 0x1da   : > { %898 = vmatmul.mubr.bf16.vlgmr.msra.gmra.mrb[8].mxu1 %v450_v40 }
 0x26d   : > { %v485_v41 = vpop.f32.mrb[0].mxu1 }
 0x26e   : > { %v859_v42 = vpop.f32.mrb[1].mxu1 }
 0x26f   : > { %v488_v43 = vpop.f32.mrb[2].mxu1 }
 0x270   : > { %v860_v44 = vpop.f32.mrb[3].mxu1 }
 0x28d   : > { %v526_v45 = vpop.f32.mrb[4].mxu1 }
 0x28e   : > { %v527_v46 = vadd.f32 %v526_v45, %v485_v41  ;;  %v879_v47 = vpop.f32.mrb[5].mxu1 }
 0x28f   : > { %v529_v48 = vpop.f32.mrb[6].mxu1 }
 0x290   : > { %v530_v49 = vadd.f32 %v529_v48, %v488_v43  ;;  %v880_v50 = vpop.f32.mrb[7].mxu1 }
 0x2ad   : > { %v567_v51 = vpop.f32.mrb[8].mxu1 }
 0x2ae   : > { %v574_v52 = vadd.f32 %v567_v51, %v527_v46  ;;  %v899_v53 = vpop.f32.mrb[9].mxu1 }
 0x2af   : > { %v570_v54 = vpop.f32.mrb[10].mxu1 }
 0x2b0   : > { %v576_v55 = vadd.f32 1e-05, %v574_v52  ;;  %v575_v56 = vadd.f32 %v570_v54, %v530_v49  ;;  %v900_v57 = vpop.f32.mrb[11].mxu1 }
 0x2b2   : > { %982 = vrsqrt.f32 %v576_v55  ;;  %v577_v58 = vadd.f32 1e-05, %v575_v56 }
 0x2b4   : > { %984 = vrsqrt.f32 %v577_v58 }
 0x2bc   : > { %v983_v59 = vpop.eup %982 }
 0x2bd   : > { %v580_v61 = vmul.f32 %v983_v59, %v1395_v23 }
 0x2be   : > { %v985_v62 = vpop.eup %984 }
 0x2bf   : > { %v589_v0 = vmul.f32 %v718_v60, %v580_v61  ;;  %v581_v1 = vmul.f32 %v985_v62, %v1398_v26 }
 0x2c1   : > { %v598_v2 = vadd.f32 %v719_v63, %v589_v0  ;;  %v590_v3 = vmul.f32 %v718_v60, %v581_v1 }
 0x2c3   : > { %v599_v4 = vadd.f32 %v719_v63, %v590_v3  ;;  %600 = vst [vmem:[%s230_s10] sm:$0xff] %v598_v2 }
 0x2c5   : > { %601 = vst [vmem:[%s230_s10 + $0x8] sm:$0xff] %v599_v4 }
 0x2c6   : > { %1057 = shalt.err (!%p1054_p7)
}
 0x2c7   : > { %s1058_s14 = scalar_lea.hbm %s1453_s26, 256  ;;  %s1062_s23 = scalar_lea.hbm %s1502_s4, 2048 }
 0x2c8   : > { %p1059_p9 = scmp.ne.s32.totalorder %s1453_s26, %s1058_s14  ;;  %p1063_p5 = scmp.lt.u32.totalorder %s1453_s26, %s1502_s4 }
 0x2c9   : > { %p1064_p10 = scmp.lt.u32.totalorder %s1062_s23, %s1058_s14  ;;  %p1066_p1 = scmp.lt.u32.totalorder %s1058_s14, %s1453_s26 }
 0x2ca   : > { %p1060_p11 = pnand %p1059_p9, %p1235_p12 }
 0x2cb   : > { %p1065_p2 = por %p1064_p10, %p1063_p5 }
 0x2cc   : > { %p1061_p0 = pneg %p1060_p11 }
 0x2cd   : > { %p1067_p4 = por %p1066_p1, %p1065_p2 }
 0x2cf   : > { %p1068_p6 = pnand %p1067_p4, %p1061_p0 }
 0x2d1   : > { %1071 = shalt.err (!%p1068_p6)
}
 0x2d2   : > { %s1125_s29 = smov 128   ;;  %s1126_s10 = smov 8  }
 0x2d3   : > { %915 = dma.vmem_to_hbm [thread:$0]  (%p1235_p12), %s1455_s6, 256, %s1453_s26, %s603_s8, %s1125_s29, %s1125_s29, %s1126_s10  }
 0x2d4 PF: > { %p932_p8 = scmp.ge.s32.totalorder %s1114_s18, 2  ;;  %s631_s5 = sand.u32 1, %s1102_s15  }
 0x2d5   : > { %p1517_p13 = scmp.ne.s32.totalorder %s1507_s22, 0  ;;  %s632_s7 = scalar_lea.sflag [#allocation4], %s631_s5 }
 0x2d7   : > { %p926_p3 = pnand %p932_p8, %p1517_p13 }
 0x2d9   : > { %1097 = dma.done.wait (!%p926_p3), %s632_s7, 256  }
 0x2da   : > { %1099 = vsyncadd (!%p926_p3), %s632_s7, 4294967040  ;;  %p18_p7 = scmp.ge.s32.totalorder %s1205_s27, 10   ;;  %s1518_s15 = smov %s1106_s16 }
 0x2db   : > { %s1519_s16 = smov %s1110_s17  ;;  %s1520_s17 = smov %s1231_s24 }
 0x2dc   : > { %s1521_s18 = smov %s1205_s27  ;;  %20 = sbr.rel (!%p18_p7) target bundleno = 6 (0x6), region = 85 }
 0x2e3   :  { %637 = vsyncpa [#allocation3], 1 }
 0x2e4   :  { %639 = vsyncpa [#allocation3 + $0x1], 1 }
 0x2e5   :  { %640 = vsyncpa [#allocation6], 1 }
 0x2e6   :  { %641 = vsyncpa [#allocation4], 1 }
 0x2e7   :  { %643 = vsyncpa [#allocation4 + $0x1], 1 }

</bundles_post_ra>
